<compile_context>
chip_gen: v6e
topology: v6e:2x2x1
jax: 0.10.0
libtpu: 0.0.40
codegen_flags: <defaults>
</compile_context>

<pallas_src>
import functools

import jax
import jax.numpy as jnp
from jax.experimental import pallas as pl
from jax.experimental.pallas import tpu as pltpu


def _residual_tcn_kernel(x_ref, wdw_ref, bias_ref, wpw_ref, o_ref, xpad_ref,
                         *, k, d, bt, c, tile_t, mxu_bf16, approx_recip):
    pad = (k - 1) * d
    t_idx = pl.program_id(1)

    # ---- causal left halo: zeros on the first T-tile, previous tile's tail
    # otherwise (carried in the persistent VMEM scratch; the T axis is
    # "arbitrary"/sequential so the carry is well-defined). ----
    if pad > 0:
        @pl.when(t_idx == 0)
        def _():
            xpad_ref[:, :, :pad] = jnp.zeros((bt, c, pad), jnp.float32)

        @pl.when(t_idx > 0)
        def _():
            xpad_ref[:, :, :pad] = xpad_ref[:, :, tile_t:tile_t + pad]

    x = x_ref[...]                        # (Bt, C, Tt) -- also the residual
    xpad_ref[:, :, pad:] = x              # stage current tile after the halo
    # TODO(synk): if profiling shows the store slot binding (v5e, single vst
    # slot), stage only the last `pad` lanes for the next tile instead of x.

    # ---- depthwise causal dilated conv (groups=C, bias=False); BN(eval) scale
    # is pre-folded into the weights, so only the bias add remains.  The last
    # tap (offset == pad) is exactly x, so use the in-register value; the other
    # taps are static slices of the scratch ref. ----
    wdw = wdw_ref[...]                                    # (C, k)
    acc = wdw[:, k - 1:k] * x
    for j in range(k - 1):
        acc = acc + wdw[:, j:j + 1] * xpad_ref[:, :, j * d:j * d + tile_t]
    y = acc + bias_ref[...]                               # (Bt, C, Tt)

    # ---- exact GELU, VALU-trimmed form:
    #   gelu(y) = relu(y) - 0.5*|y| * poly(u) * exp(-z^2),   z = y/sqrt(2)
    # (erf via A&S 7.1.26, ~1.5e-7 abs err).  exp / reciprocal run on the EUP.
    ay = jnp.abs(y)
    az = 0.7071067811865476 * ay
    den = 1.0 + 0.3275911 * az
    u = pl.reciprocal(den, approx=True) if approx_recip else 1.0 / den
    poly = u * (0.254829592 + u * (-0.284496736 + u * (1.421413741
             + u * (-1.453152027 + u * 1.061405429))))
    g = jnp.maximum(y, 0.0) - (0.5 * ay) * (poly * jnp.exp(-az * az))

    # ---- pointwise 1x1 conv == channel-mixing matmul (MXU), f32 accumulation.
    # w_pw is pre-cast in the wrapper; with bt == 1 this is one wide
    # (C,C)@(C,Tt) dot and one lane-dense store.  Residual add stays in f32. ----
    wpw = wpw_ref[...]
    g_m = g.astype(jnp.bfloat16) if mxu_bf16 else g
    if bt == 1:
        pw = jnp.dot(wpw, g_m[0], preferred_element_type=jnp.float32)
        o_ref[0] = (x[0] + pw).astype(o_ref.dtype)
    else:
        for i in range(bt):
            pw = jnp.dot(wpw, g_m[i], preferred_element_type=jnp.float32)
            o_ref[i] = (x[i] + pw).astype(o_ref.dtype)


def _vmem_limit_bytes():
    """Generation-aware VMEM limit: ~3/4 of physical per-core VMEM
    (v5e/v6e: 128 MiB -> 96 MiB, v7x: 64 MiB -> 48 MiB).  Conservative
    fallback (48 MiB) if the hardware query is unavailable."""
    phys = 64 * 1024 * 1024
    try:
        cap = int(pltpu.get_tpu_info().vmem_capacity_bytes)
        if cap > 0:
            phys = cap
    except Exception:
        pass
    return (phys * 3) // 4


def _pick_tiles(b, c, t_pad, pad, vmem_limit, weight_bytes, itemsize=4):
    """Prefer growing tile_t (one wide MXU dot, big lane-dense blocks); only
    bump tile_b when a full-T row is tiny.  Per-step VMEM is budgeted as
    ~10x the activation block (2x in + 2x out double buffers + halo scratch +
    ~5 live f32 temporaries) plus the double-buffered grid-invariant weights."""
    avail = max(vmem_limit - 2 * weight_bytes, vmem_limit // 2)
    block_budget = max(avail // 10, c * 128 * itemsize)

    tile_t = t_pad
    if c * t_pad * itemsize > block_budget:
        for cand in (4096, 2048, 1024, 512, 256, 128):
            if (t_pad % cand == 0 and cand >= pad
                    and c * cand * itemsize <= block_budget):
                tile_t = cand
                break

    tile_b = 1
    if tile_t == t_pad and c * tile_t * itemsize <= block_budget // 8:
        for cand in (8, 4, 2):
            # keep >= 2 B-blocks so both v7x TensorCores get work
            if (b % cand == 0 and b // cand >= 2
                    and cand * c * tile_t * itemsize <= block_budget):
                tile_b = cand
                break
    return tile_b, tile_t


def residual_tcn(x, w_dw, w_pw, bn_scale, bn_bias, *, k, d,
                 mxu_bf16=None, approx_recip=True, tile_t=None, tile_b=None):
    """x: (B, C, T) f32.  w_dw: (C, k).  w_pw: (C, C).  bn_scale/bias: (C, 1)."""
    b, c, t = x.shape
    pad = (k - 1) * d

    # bf16 MXU inputs only pay off when C is large enough to feed the MXU;
    # for small C the per-element g cast is wasted VPU work.
    if mxu_bf16 is None:
        mxu_bf16 = c >= 256

    # Fold BN (eval) scale into the per-channel depthwise weights (linear op);
    # pre-cast the pointwise weight once in the wrapper (not per grid step).
    w_dw_eff = (w_dw * bn_scale).astype(jnp.float32)                  # (C, k)
    bn_bias = bn_bias.astype(jnp.float32)                             # (C, 1)
    w_pw_eff = w_pw.astype(jnp.bfloat16 if mxu_bf16 else jnp.float32)  # (C, C)

    # Lane-dense output blocks: pad T to a multiple of 128 (trailing zeros do
    # not change a causal conv's first T outputs); slice the result back.
    t_pad_len = ((t + 127) // 128) * 128
    x_in = x if t_pad_len == t else jnp.pad(
        x, ((0, 0), (0, 0), (0, t_pad_len - t)))

    vmem_limit = _vmem_limit_bytes()
    weight_bytes = (c * k + c) * 4 + c * c * w_pw_eff.dtype.itemsize
    auto_b, auto_t = _pick_tiles(b, c, t_pad_len, pad, vmem_limit, weight_bytes)
    if tile_t is None:
        tile_t = auto_t
    if tile_b is None:
        tile_b = auto_b
    assert t_pad_len % tile_t == 0 and b % tile_b == 0
    assert tile_t % 128 == 0                              # lane-dense blocks
    nb, nt = b // tile_b, t_pad_len // tile_t
    if nt > 1:
        assert tile_t >= pad                              # halo fits one tile

    kernel = functools.partial(
        _residual_tcn_kernel, k=k, d=d, bt=tile_b, c=c, tile_t=tile_t,
        mxu_bf16=mxu_bf16, approx_recip=approx_recip)

    out = pl.pallas_call(
        kernel,
        out_shape=jax.ShapeDtypeStruct((b, c, t_pad_len), x.dtype),
        grid_spec=pltpu.PrefetchScalarGridSpec(
            num_scalar_prefetch=0,
            grid=(nb, nt),
            in_specs=[
                pl.BlockSpec((tile_b, c, tile_t), lambda i, j: (i, 0, j)),  # x
                pl.BlockSpec((c, k), lambda i, j: (0, 0)),   # depthwise w * BN scale
                pl.BlockSpec((c, 1), lambda i, j: (0, 0)),   # BN bias
                pl.BlockSpec((c, c), lambda i, j: (0, 0)),   # pointwise w
            ],
            out_specs=pl.BlockSpec((tile_b, c, tile_t), lambda i, j: (i, 0, j)),
            scratch_shapes=[
                # persistent [halo | tile] buffer; carries the causal halo
                # across T-tiles of the same batch block.
                pltpu.VMEM((tile_b, c, tile_t + pad), jnp.float32),
            ],
        ),
        compiler_params=pltpu.CompilerParams(
            # B-tiles independent (megacore parallel); T-tiles carry the halo.
            dimension_semantics=("parallel", "arbitrary"),
            vmem_limit_bytes=vmem_limit,
        ),
    )(x_in, w_dw_eff, bn_bias, w_pw_eff)
    return out if t_pad_len == t else out[:, :, :t]


def make_params(key, channels, k, d):
    """Deterministic synthetic params; applies weight_norm + folds BN (eval)."""
    ks = jax.random.split(key, 8)
    # depthwise: weight_norm(v: (C,1,k), g: (C,1,1)), norm over dims (1,2)
    v_dw = jax.random.normal(ks[0], (channels, 1, k), jnp.float32)
    g_dw = jax.random.uniform(ks[1], (channels, 1, 1), jnp.float32, 0.5, 1.5)
    w_dw = g_dw * v_dw / jnp.sqrt(jnp.sum(v_dw ** 2, axis=(1, 2), keepdims=True))
    w_dw = w_dw[:, 0, :]                                   # (C, k)
    # pointwise: weight_norm(v: (C,C,1), g: (C,1,1)), norm over dims (1,2)
    v_pw = jax.random.normal(ks[2], (channels, channels, 1), jnp.float32)
    g_pw = jax.random.uniform(ks[3], (channels, 1, 1), jnp.float32, 0.5, 1.5)
    w_pw = g_pw * v_pw / jnp.sqrt(jnp.sum(v_pw ** 2, axis=(1, 2), keepdims=True))
    w_pw = w_pw[:, :, 0]                                   # (C, C)
    # BatchNorm1d (eval): fold gamma/beta/running stats into scale/bias
    gamma = jax.random.uniform(ks[4], (channels,), jnp.float32, 0.5, 1.5)
    beta = 0.1 * jax.random.normal(ks[5], (channels,), jnp.float32)
    r_mean = 0.1 * jax.random.normal(ks[6], (channels,), jnp.float32)
    r_var = jax.random.uniform(ks[7], (channels,), jnp.float32, 0.5, 1.5)
    eps = 1e-5
    scale = gamma / jnp.sqrt(r_var + eps)
    bias = beta - r_mean * scale
    return w_dw, w_pw, scale[:, None], bias[:, None]


def residual_tcn_ref(x, w_dw, w_pw, bn_scale, bn_bias, *, k, d):
    """Pure-JAX reference of the same forward semantics."""
    b, c, t = x.shape
    pad = (k - 1) * d
    xp = jnp.pad(x, ((0, 0), (0, 0), (pad, 0)))
    y = sum(w_dw[None, :, j:j + 1] * xp[:, :, j * d: j * d + t]
            for j in range(k))
    y = y * bn_scale[None] + bn_bias[None]
    g = jax.nn.gelu(y, approximate=False)
    pw = jnp.einsum('oc,bct->bot', w_pw, g)
    return x + pw


if __name__ == "__main__":
    B, C, T, K, D = 2, 8, 128, 3, 2
    key = jax.random.PRNGKey(0)
    kx, kx2, kx3, kp = jax.random.split(key, 4)
    x = jax.random.normal(kx, (B, C, T), jnp.float32)
    w_dw, w_pw, bn_scale, bn_bias = make_params(kp, C, K, D)
    ref = residual_tcn_ref(x, w_dw, w_pw, bn_scale, bn_bias, k=K, d=D)

    # 1) exact-precision configuration (f32 MXU, exact reciprocal): strict check.
    out = residual_tcn(x, w_dw, w_pw, bn_scale, bn_bias, k=K, d=D,
                       mxu_bf16=False, approx_recip=False)
    out = jax.block_until_ready(out)
    assert out.shape == (B, C, T)
    err = float(jnp.max(jnp.abs(out - ref)))
    assert jnp.allclose(out, ref, atol=1e-4, rtol=1e-4), err

    # 2) default configuration (auto mxu_bf16 by C, EUP approx reciprocal).
    out_d = residual_tcn(x, w_dw, w_pw, bn_scale, bn_bias, k=K, d=D)
    out_d = jax.block_until_ready(out_d)
    err_d = float(jnp.max(jnp.abs(out_d - ref)))
    assert jnp.allclose(out_d, ref, atol=1e-2, rtol=1e-2), err_d

    # 3) perf configuration with bf16 MXU inputs (f32 accumulation/residual),
    #    checked at a reduced-precision tolerance.
    out_f = residual_tcn(x, w_dw, w_pw, bn_scale, bn_bias, k=K, d=D,
                         mxu_bf16=True, approx_recip=True)
    out_f = jax.block_until_ready(out_f)
    err_f = float(jnp.max(jnp.abs(out_f - ref)))
    assert jnp.allclose(out_f, ref, atol=1e-1, rtol=1e-1), err_f

    # 4) multi-tile grid: exercises the causal-halo carry across T-tiles and
    #    multiple parallel B-tiles (exact config, strict check).
    T2 = 256
    x2 = jax.random.normal(kx2, (B, C, T2), jnp.float32)
    ref2 = residual_tcn_ref(x2, w_dw, w_pw, bn_scale, bn_bias, k=K, d=D)
    out2 = residual_tcn(x2, w_dw, w_pw, bn_scale, bn_bias, k=K, d=D,
                        mxu_bf16=False, approx_recip=False,
                        tile_t=128, tile_b=1)
    out2 = jax.block_until_ready(out2)
    err2 = float(jnp.max(jnp.abs(out2 - ref2)))
    assert jnp.allclose(out2, ref2, atol=1e-4, rtol=1e-4), err2

    # 5) non-multiple-of-128 T: exercises the lane-dense wrapper pad + slice.
    T3 = 200
    x3 = jax.random.normal(kx3, (B, C, T3), jnp.float32)
    ref3 = residual_tcn_ref(x3, w_dw, w_pw, bn_scale, bn_bias, k=K, d=D)
    out3 = residual_tcn(x3, w_dw, w_pw, bn_scale, bn_bias, k=K, d=D,
                        mxu_bf16=False, approx_recip=False)
    out3 = jax.block_until_ready(out3)
    assert out3.shape == (B, C, T3)
    err3 = float(jnp.max(jnp.abs(out3 - ref3)))
    assert jnp.allclose(out3, ref3, atol=1e-4, rtol=1e-4), err3

    print("KERNEL_OK")
</pallas_src>

<mosaic_0001>
module attributes {stable_mosaic.version = 11 : i64} {
  func.func @_residual_tcn_kernel(%arg0: i32, %arg1: i32, %arg2: memref<1x8x128xf32, #tpu.memory_space<vmem>>, %arg3: memref<8x3xf32, #tpu.memory_space<vmem>>, %arg4: memref<8x1xf32, #tpu.memory_space<vmem>>, %arg5: memref<8x8xf32, #tpu.memory_space<vmem>>, %arg6: memref<1x8x128xf32, #tpu.memory_space<vmem>>, %arg7: memref<1x8x132xf32, #tpu.memory_space<vmem>>) attributes {dimension_semantics = [#tpu.dimension_semantics<parallel>, #tpu.dimension_semantics<arbitrary>], iteration_bounds = array<i64: 2, 1>, scalar_prefetch = 0 : i64, scratch_operands = 1 : i64, tpu.core_type = #tpu.core_type<tc>, window_params = [{transform_indices = @transform_0, window_bounds = array<i64: 1, 8, 128>}, {pipeline_mode = #tpu.pipeline_mode<synchronous>, transform_indices = @transform_1, window_bounds = array<i64: 8, 3>}, {pipeline_mode = #tpu.pipeline_mode<synchronous>, transform_indices = @transform_2, window_bounds = array<i64: 8, 1>}, {pipeline_mode = #tpu.pipeline_mode<synchronous>, transform_indices = @transform_3, window_bounds = array<i64: 8, 8>}, {transform_indices = @transform_4, window_bounds = array<i64: 1, 8, 128>}]} {
    %c0_i32 = arith.constant 0 : i32
    %0 = arith.cmpi eq, %arg1, %c0_i32 : i32
    %1 = arith.extui %0 : i1 to i32
    %c0_i32_0 = arith.constant 0 : i32
    %2 = arith.cmpi ne, %1, %c0_i32_0 : i32
    scf.if %2 {
      %cst_33 = arith.constant 0.000000e+00 : f32
      %71 = vector.broadcast %cst_33 : f32 to vector<1x8x4xf32>
      %c0_34 = arith.constant 0 : index
      %c0_35 = arith.constant 0 : index
      %c0_36 = arith.constant 0 : index
      %72 = vector.load %arg7[%c0_34, %c0_35, %c0_36] : memref<1x8x132xf32, #tpu.memory_space<vmem>>, vector<1x8x4xf32>
      tpu.vector_store %arg7[%c0_34, %c0_35, %c0_36], %71 {strides = array<i32>} : memref<1x8x132xf32, #tpu.memory_space<vmem>>, vector<1x8x4xf32>,
    } else {
    }
    %c0_i32_1 = arith.constant 0 : i32
    %3 = arith.cmpi sgt, %arg1, %c0_i32_1 : i32
    %4 = arith.extui %3 : i1 to i32
    %c0_i32_2 = arith.constant 0 : i32
    %5 = arith.cmpi ne, %4, %c0_i32_2 : i32
    scf.if %5 {
      %c0_33 = arith.constant 0 : index
      %c0_34 = arith.constant 0 : index
      %c128 = arith.constant 128 : index
      %71 = vector.load %arg7[%c0_33, %c0_34, %c128] : memref<1x8x132xf32, #tpu.memory_space<vmem>>, vector<1x8x4xf32>
      %c0_35 = arith.constant 0 : index
      %c0_36 = arith.constant 0 : index
      %c0_37 = arith.constant 0 : index
      %72 = vector.load %arg7[%c0_35, %c0_36, %c0_37] : memref<1x8x132xf32, #tpu.memory_space<vmem>>, vector<1x8x4xf32>
      tpu.vector_store %arg7[%c0_35, %c0_36, %c0_37], %71 {strides = array<i32>} : memref<1x8x132xf32, #tpu.memory_space<vmem>>, vector<1x8x4xf32>,
    } else {
    }
    %c0 = arith.constant 0 : index
    %c0_3 = arith.constant 0 : index
    %c0_4 = arith.constant 0 : index
    %6 = vector.load %arg2[%c0, %c0_3, %c0_4] : memref<1x8x128xf32, #tpu.memory_space<vmem>>, vector<1x8x128xf32>
    %c0_5 = arith.constant 0 : index
    %c0_6 = arith.constant 0 : index
    %c4 = arith.constant 4 : index
    %7 = vector.load %arg7[%c0_5, %c0_6, %c4] : memref<1x8x132xf32, #tpu.memory_space<vmem>>, vector<1x8x128xf32>
    tpu.vector_store %arg7[%c0_5, %c0_6, %c4], %6 {strides = array<i32>} : memref<1x8x132xf32, #tpu.memory_space<vmem>>, vector<1x8x128xf32>,
    %c0_7 = arith.constant 0 : index
    %c0_8 = arith.constant 0 : index
    %8 = vector.load %arg3[%c0_7, %c0_8] : memref<8x3xf32, #tpu.memory_space<vmem>>, vector<8x3xf32>
    %9 = vector.extract_strided_slice %8 {offsets = [0, 2], sizes = [8, 1], strides = [1, 1]} : vector<8x3xf32> to vector<8x1xf32>
    %10 = vector.shape_cast %9 : vector<8x1xf32> to vector<1x8x1xf32>
    %11 = vector.broadcast %10 : vector<1x8x1xf32> to vector<1x8x128xf32>
    %12 = arith.mulf %11, %6 : vector<1x8x128xf32>
    %13 = vector.extract_strided_slice %8 {offsets = [0, 0], sizes = [8, 1], strides = [1, 1]} : vector<8x3xf32> to vector<8x1xf32>
    %c0_9 = arith.constant 0 : index
    %c0_10 = arith.constant 0 : index
    %c0_11 = arith.constant 0 : index
    %14 = vector.load %arg7[%c0_9, %c0_10, %c0_11] : memref<1x8x132xf32, #tpu.memory_space<vmem>>, vector<1x8x128xf32>
    %15 = vector.shape_cast %13 : vector<8x1xf32> to vector<1x8x1xf32>
    %16 = vector.broadcast %15 : vector<1x8x1xf32> to vector<1x8x128xf32>
    %17 = arith.mulf %16, %14 : vector<1x8x128xf32>
    %18 = arith.addf %12, %17 : vector<1x8x128xf32>
    %19 = vector.extract_strided_slice %8 {offsets = [0, 1], sizes = [8, 1], strides = [1, 1]} : vector<8x3xf32> to vector<8x1xf32>
    %c0_12 = arith.constant 0 : index
    %c0_13 = arith.constant 0 : index
    %c2 = arith.constant 2 : index
    %20 = vector.load %arg7[%c0_12, %c0_13, %c2] : memref<1x8x132xf32, #tpu.memory_space<vmem>>, vector<1x8x128xf32>
    %21 = vector.shape_cast %19 : vector<8x1xf32> to vector<1x8x1xf32>
    %22 = vector.broadcast %21 : vector<1x8x1xf32> to vector<1x8x128xf32>
    %23 = arith.mulf %22, %20 : vector<1x8x128xf32>
    %24 = arith.addf %18, %23 : vector<1x8x128xf32>
    %c0_14 = arith.constant 0 : index
    %c0_15 = arith.constant 0 : index
    %25 = vector.load %arg4[%c0_14, %c0_15] : memref<8x1xf32, #tpu.memory_space<vmem>>, vector<8x1xf32>
    %26 = vector.shape_cast %25 : vector<8x1xf32> to vector<1x8x1xf32>
    %27 = vector.broadcast %26 : vector<1x8x1xf32> to vector<1x8x128xf32>
    %28 = arith.addf %24, %27 : vector<1x8x128xf32>
    %29 = math.absf %28 : vector<1x8x128xf32>
    %cst = arith.constant 0.707106769 : f32
    %30 = vector.broadcast %cst : f32 to vector<1x8x128xf32>
    %31 = arith.mulf %30, %29 : vector<1x8x128xf32>
    %cst_16 = arith.constant 0.327591091 : f32
    %32 = vector.broadcast %cst_16 : f32 to vector<1x8x128xf32>
    %33 = arith.mulf %32, %31 : vector<1x8x128xf32>
    %cst_17 = arith.constant 1.000000e+00 : f32
    %34 = vector.broadcast %cst_17 : f32 to vector<1x8x128xf32>
    %35 = arith.addf %34, %33 : vector<1x8x128xf32>
    %cst_18 = arith.constant 1.000000e+00 : f32
    %36 = vector.broadcast %cst_18 : f32 to vector<1x8x128xf32>
    %37 = arith.divf %36, %35 : vector<1x8x128xf32>
    %cst_19 = arith.constant 1.06140542 : f32
    %38 = vector.broadcast %cst_19 : f32 to vector<1x8x128xf32>
    %39 = arith.mulf %37, %38 : vector<1x8x128xf32>
    %cst_20 = arith.constant -1.45315206 : f32
    %40 = vector.broadcast %cst_20 : f32 to vector<1x8x128xf32>
    %41 = arith.addf %40, %39 : vector<1x8x128xf32>
    %42 = arith.mulf %37, %41 : vector<1x8x128xf32>
    %cst_21 = arith.constant 1.42141378 : f32
    %43 = vector.broadcast %cst_21 : f32 to vector<1x8x128xf32>
    %44 = arith.addf %43, %42 : vector<1x8x128xf32>
    %45 = arith.mulf %37, %44 : vector<1x8x128xf32>
    %cst_22 = arith.constant -0.284496725 : f32
    %46 = vector.broadcast %cst_22 : f32 to vector<1x8x128xf32>
    %47 = arith.addf %46, %45 : vector<1x8x128xf32>
    %48 = arith.mulf %37, %47 : vector<1x8x128xf32>
    %cst_23 = arith.constant 0.254829586 : f32
    %49 = vector.broadcast %cst_23 : f32 to vector<1x8x128xf32>
    %50 = arith.addf %49, %48 : vector<1x8x128xf32>
    %51 = arith.mulf %37, %50 : vector<1x8x128xf32>
    %cst_24 = arith.constant 0.000000e+00 : f32
    %52 = vector.broadcast %cst_24 : f32 to vector<1x8x128xf32>
    %53 = arith.maximumf %28, %52 : vector<1x8x128xf32>
    %cst_25 = arith.constant 5.000000e-01 : f32
    %54 = vector.broadcast %cst_25 : f32 to vector<1x8x128xf32>
    %55 = arith.mulf %54, %29 : vector<1x8x128xf32>
    %cst_26 = arith.constant 0.000000e+00 : f32
    %56 = vector.broadcast %cst_26 : f32 to vector<1x8x128xf32>
    %57 = arith.subf %56, %31 : vector<1x8x128xf32>
    %58 = arith.mulf %57, %31 : vector<1x8x128xf32>
    %59 = math.exp %58 : vector<1x8x128xf32>
    %60 = arith.mulf %51, %59 : vector<1x8x128xf32>
    %61 = arith.mulf %55, %60 : vector<1x8x128xf32>
    %62 = arith.subf %53, %61 : vector<1x8x128xf32>
    %c0_27 = arith.constant 0 : index
    %c0_28 = arith.constant 0 : index
    %63 = vector.load %arg5[%c0_27, %c0_28] : memref<8x8xf32, #tpu.memory_space<vmem>>, vector<8x8xf32>
    %64 = vector.shape_cast %62 : vector<1x8x128xf32> to vector<8x128xf32>
    %cst_29 = arith.constant dense<0.000000e+00> : vector<8x128xf32>
    %65 = tpu.matmul %63, %64, %cst_29 {dimension_numbers = #tpu.dot_dimension_numbers<[1], [0], [0], [1], [0, 0, 1, 1], [], []>} : vector<8x8xf32>, vector<8x128xf32>, vector<8x128xf32> -> vector<8x128xf32>
    %66 = vector.shape_cast %6 : vector<1x8x128xf32> to vector<8x128xf32>
    %67 = arith.addf %66, %65 : vector<8x128xf32>
    %c0_30 = arith.constant 0 : index
    %c0_31 = arith.constant 0 : index
    %c0_32 = arith.constant 0 : index
    %68 = vector.load %arg6[%c0_30, %c0_31, %c0_32] : memref<1x8x128xf32, #tpu.memory_space<vmem>>, vector<1x8x128xf32>
    %69 = vector.shape_cast %68 : vector<1x8x128xf32> to vector<8x128xf32>
    %70 = vector.shape_cast %67 : vector<8x128xf32> to vector<1x8x128xf32>
    tpu.vector_store %arg6[%c0_30, %c0_31, %c0_32], %70 {strides = array<i32>} : memref<1x8x128xf32, #tpu.memory_space<vmem>>, vector<1x8x128xf32>,
    return
  }
  func.func @transform_0(%arg0: i32, %arg1: i32) -> (i32, i32, i32) {
    %c0_i32 = arith.constant 0 : i32
    %c0_i32_0 = arith.constant 0 : i32
    return %arg0, %c0_i32, %arg1 : i32, i32, i32
  }
  func.func @transform_1(%arg0: i32, %arg1: i32) -> (i32, i32) {
    %c0_i32 = arith.constant 0 : i32
    %c0_i32_0 = arith.constant 0 : i32
    %c0_i32_1 = arith.constant 0 : i32
    return %c0_i32, %c0_i32_0 : i32, i32
  }
  func.func @transform_2(%arg0: i32, %arg1: i32) -> (i32, i32) {
    %c0_i32 = arith.constant 0 : i32
    %c0_i32_0 = arith.constant 0 : i32
    %c0_i32_1 = arith.constant 0 : i32
    return %c0_i32, %c0_i32_0 : i32, i32
  }
  func.func @transform_3(%arg0: i32, %arg1: i32) -> (i32, i32) {
    %c0_i32 = arith.constant 0 : i32
    %c0_i32_0 = arith.constant 0 : i32
    %c0_i32_1 = arith.constant 0 : i32
    return %c0_i32, %c0_i32_0 : i32, i32
  }
  func.func @transform_4(%arg0: i32, %arg1: i32) -> (i32, i32, i32) {
    %c0_i32 = arith.constant 0 : i32
    %c0_i32_0 = arith.constant 0 : i32
    return %arg0, %c0_i32, %arg1 : i32, i32, i32
  }
}

</mosaic_0001>

<bundles_post_ra>
// kernel: tpu_custom_call.1
= control target key start
LH: loop header
LB: loop body
LE: loop exit
PB: predicated region body
PF: predicated region fallthrough
CT: control target
= control target key end

     0   :  { %9 = vsyncpa [#allocation4], 0  ;;  %s787_s0 = inlined_call_operand.vmem [shape: f32[2,8,128], index: 0, kind: input, shape index: {}]   ;;  %s788_s1 = inlined_call_operand.vmem [shape: f32[8,3], index: 1, kind: input, shape index: {}]   ;;  %s789_s2 = inlined_call_operand.vmem [shape: f32[8,1], index: 2, kind: input, shape index: {}]   ;;  %s790_s3 = inlined_call_operand.vmem [shape: f32[8,8], index: 3, kind: input, shape index: {}]   ;;  %s791_s4 = inlined_call_operand.hbm [shape: f32[2,8,128], index: 4, kind: output, shape index: {}]  }
   0x1   :  { %11 = vsyncpa [#allocation4 + $0x1], 0  ;;  %s666_s15 = smov 0   ;;  %s668_s16 = smov 0  }
   0x2   :  { %s670_s17 = smov 0   ;;  %s672_s18 = smov 0  }
   0x3   :  { %s674_s19 = smov 0   ;;  %s676_s20 = smov 0  }
   0x4 LB: > { %s466_s21 = sadd.s32 4294967295, %s631_s20   ;;  %s467_s22 = sadd.s32 4294967294, %s631_s20   ;;  %s631_s20 = sphi %s676_s20, %s17_s20   ;;  %s627_s19 = sphi %s674_s19, %s798_s19   ;;  %s623_s18 = sphi %s672_s18, %s797_s18   ;;  %s619_s17 = sphi %s670_s17, %s796_s17   ;;  %s615_s16 = sphi %s668_s16, %s795_s16   ;;  %s611_s15 = sphi %s666_s15, %s794_s15  }
   0x5   : > { %s29_s23 = sadd.s32 1, %s627_s19  ;;  %s129_s24 = sadd.s32 1, %s619_s17 }
   0x6   : > { %p31_p0 = scmp.ge.s32.totalorder %s29_s23, 2  ;;  %p139_p1 = scmp.ne.s32.totalorder %s619_s17, %s615_s16 }
   0x7   : > { %p140_p2 = scmp.eq.s32.totalorder %s466_s21, 1  ;;  %p145_p3 = scmp.ne.s32.totalorder %s615_s16, %s611_s15 }
   0x8   : > { %s800_s23 = smov (%p31_p0, %s29_s23), 0  ;;  %p146_p5 = scmp.eq.s32.totalorder %s467_s22, 1 }
   0x9   : > { %p706_p4 = por %p140_p2, %p139_p1  ;;  %s124_s26 = ssub.s32 %s627_s19, %s800_s23 }
   0xa   : > { %p470_p6 = scmp.ge.s32.totalorder %s631_s20, 1  ;;  %p127_p7 = scmp.eq.s32.totalorder %s124_s26, 0 }
   0xb   : > { %p713_p8 = por %p146_p5, %p145_p3  ;;  %p183_p9 = scmp.lt.s32.totalorder %s631_s20, 3 }
   0xc   : > { %s719_s28 = scalar_select %p127_p7, %s619_s17, %s129_s24  }
   0xd   : > { %p184_p10 = pnand %p470_p6, %p183_p9 }
   0xe   : > { %p211_p11 = scmp.lt.s32.totalorder (!%p184_p10), %s623_s18, 1  ;;  %s637_s10 = smov (!%p184_p10), 4  }
   0xf   : > { %187 = sbr.rel (%p184_p10) target bundleno = 530 (0x212), region = 36  ;;  %s638_s13 = smov (!%p184_p10), 126  }
  0x10   : > { %s208_s22 = sand.u32 (!%p184_p10), 1, %s615_s16   ;;  %s475_s26 = sshll.u32 (!%p184_p10), %s623_s18, 7 }
  0x11   : > { %s471_s24 = sshll.u32 (!%p184_p10), %s208_s22, 3  ;;  %s747_s7 = scalar_lea.hbm (!%p184_p10), %s791_s4, %s475_s26 }
  0x12   : > { %s210_s29 = scalar_lea.vmem (!%p184_p10), [#allocation3], %s471_s24  ;;  %s381_s8 = scalar_lea.sflag (!%p184_p10), [#allocation4], %s208_s22 }
  0x13   : > { %s395_s30 = sshll.u32 (!%p184_p10), %s210_s29, 4  ;;  %s396_s30 = int_to_ptr.vmem [resolvable:$true] %s395_s30 }
  0x14   : > { %v240_v0 = vld [vmem:[%s788_s1] sm:$0xff]  ;;  %v633_v1 = vmov 2   ;;  %v634_v2 = vmov 1   ;;  %vm222_vm0 = vcmask 31744   ;;  %s212_s5 = scalar_select %p211_p11, %s623_s18, 1  ;;  %v635_v3 = vmov 0.0  }
  0x15   : > { %548 = vset.pattern.permute.xlu1 %v633_v1  ;;  %547 = vset.pattern.permute.xlu0 %v634_v2  ;;  %223 = vst.msk [vmem:[#allocation2] sm:$0xff] %vm222_vm0, %v635_v3  ;;  %v636_v4 = vmov 0   ;;  %v272_v6 = vld [vmem:[%s789_s2] sm:$0xff]  ;;  %vm236_vm1 = vcmask 1047584   ;;  %vm639_vm2 = vmmov 0   ;;  %vm268_vm3 = vcmask 1031168  }
  0x16   : > { %243 = vperm.xlu1 %548, %v240_v0   ;;  %480 = vmatprep.subr.mxu0 %v635_v3  ;;  %s472_s6 = sshll.u32 %s212_s5, 3  ;;  %v303_v47 = vld [vmem:[%s790_s3] sm:$0xff]  ;;  %vm304_vm4 = vcmask 64512   ;;  %s640_s18 = smov [#allocation3]  }
  0x17   : > { %s217_s9 = scalar_lea.vmem %s787_s0, %s472_s6  ;;  %482 = vmatprep.mubr.msk.f32.mxu0 %vm639_vm2, %v635_v3 }
  0x18   : > { %v730_v5 = vld [vmem:[%s217_s9] sm:$0xff]  ;;  %s555_s9 = scalar_lea.vmem %s396_s30, 128 }
  0x19   : > { %233 = vrot.lane.b32.xlu0 %v730_v5, %s637_s10  ;;  %p556_p12 = scmp.ne.s32.totalorder %s396_s30, %s555_s9  ;;  %s559_s10 = sshll.u32 %s640_s18, 4  ;;  %s560_s10 = int_to_ptr.vmem [resolvable:$false] %s559_s10 }
  0x1a   : > { %549 = vset.pattern.permute.xlu1 %v636_v4  ;;  %s561_s11 = scalar_lea.vmem %s560_s10, 256  ;;  %p562_p1 = scmp.lt.s32.totalorder %s396_s30, %s560_s10 }
  0x1b   : > { %249 = vperm.xlu1 %549, %v240_v0   ;;  %p557_p13 = pnand %p556_p12, %p706_p4  ;;  %p563_p2 = scmp.lt.s32.totalorder %s561_s11, %s555_s9 }
  0x1d   : > { %257 = vperm.xlu0 %547, %v240_v0   ;;  %p558_p0 = pneg %p557_p13  ;;  %p564_p3 = por %p563_p2, %p562_p1 }
  0x1f   : > { %275 = vperm.xlu1 %549, %v272_v6   ;;  %p565_p5 = pnand %p564_p3, %p558_p0 }
  0x21   : > { %550 = vset.pattern.permute.xlu0 %v636_v4 }
  0x8b   : > { %v234_v7 = vpop.permute.xlu0 %233 }
  0x8c   : > { %237 = vst.msk [vmem:[#allocation2] sm:$0xff] %vm236_vm1, %v234_v7 }
  0x8d   : > { %239 = vst.msk [vmem:[#allocation2 + $0x8] sm:$0xff] %vm222_vm0, %v234_v7 }
  0x91   : > { %v244_v13 = vpop.permute.xlu1 %243 }
  0x92   : > { %v246_v15 = vmul.f32 %v244_v13, %v730_v5 }
  0x93   : > { %v247_v8 = vld [vmem:[#allocation2] sm:$0xff] }
  0x94   : > { %v255_v9 = vld [vmem:[#allocation2 + $0x8] sm:$0xff] }
  0x96   : > { %v250_v14 = vpop.permute.xlu1 %249 }
  0x97   : > { %v252_v16 = vmul.f32 %v250_v14, %v247_v8 }
  0x98   : > { %v258_v10 = vpop.permute.xlu0 %257 }
  0x99   : > { %v260_v11 = vmul.f32 %v258_v10, %v247_v8  ;;  %v261_v12 = vmul.f32 %v258_v10, %v255_v9  ;;  %v253_v18 = vadd.f32 %v252_v16, %v246_v15 }
  0x9a   : > { %v276_v17 = vpop.permute.xlu1 %275 }
  0x9b   : > { %266 = vrot.lane.b32.xlu1 %v261_v12, %s638_s13  ;;  %264 = vrot.lane.b32.xlu0 %v260_v11, %s638_s13 }
 0x10d   : > { %v267_v19 = vpop.permute.xlu1 %266  ;;  %v265_v20 = vpop.permute.xlu0 %264 }
 0x10e   : > { %v269_v21 = vsel %vm268_vm3, %v265_v20, %v267_v19 }
 0x10f   : > { %v271_v22 = vadd.f32 %v269_v21, %v253_v18 }
 0x111   : > { %v278_v23 = vadd.f32 %v276_v17, %v271_v22 }
 0x113   : > { %v279_v24 = vand.u32 2147483647, %v278_v23  ;;  %v294_v44 = vmax.f32 %v278_v23, 0.0 }
 0x115   : > { %v280_v25 = vmul.f32 0.70710677, %v279_v24  ;;  %v295_v42 = vmul.f32 0.5, %v279_v24 }
 0x117   : > { %v281_v26 = vmul.f32 0.3275911, %v280_v25  ;;  %v296_v28 = vsub.f32 0.0, %v280_v25 }
 0x119   : > { %v282_v27 = vadd.f32 1.0, %v281_v26  ;;  %v297_v29 = vmul.f32 %v296_v28, %v280_v25 }
 0x11b   : > { %551 = vrcp.f32 %v282_v27  ;;  %v298_v31 = vmul.f32 1.442695, %v297_v29 }
 0x11d   : > { %553 = vpow2.f32 %v298_v31 }
 0x128   : > { %v552_v30 = vpop.eup %551 }
 0x129   : > { %v285_v32 = vmul.f32 1.0614054, %v552_v30 }
 0x12a   : > { %v554_v41 = vpop.eup %553 }
 0x12b   : > { %v286_v33 = vadd.f32 -1.4531521, %v285_v32 }
 0x12d   : > { %v287_v34 = vmul.f32 %v552_v30, %v286_v33 }
 0x12f   : > { %v288_v35 = vadd.f32 1.4214138, %v287_v34 }
 0x131   : > { %v289_v36 = vmul.f32 %v552_v30, %v288_v35 }
 0x133   : > { %v290_v37 = vadd.f32 -0.28449672, %v289_v36 }
 0x135   : > { %v291_v38 = vmul.f32 %v552_v30, %v290_v37 }
 0x137   : > { %v292_v39 = vadd.f32 0.2548296, %v291_v38 }
 0x139   : > { %v293_v40 = vmul.f32 %v552_v30, %v292_v39 }
 0x13b   : > { %v300_v43 = vmul.f32 %v554_v41, %v293_v40 }
 0x13d   : > { %v301_v45 = vmul.f32 %v300_v43, %v295_v42 }
 0x13f   : > { %v302_v46 = vsub.f32 %v294_v44, %v301_v45 }
 0x141   : > { %481 = vmatpush3.msra.mxu0 %v302_v46 }
 0x142   : > { %483 = vmatmul.mubr.msk.f32.vlgmr.msra.gmra.mxu0 %vm304_vm4, %v303_v47 }
 0x202   : > { %v374_v48 = vpop.f32.mrf.mxu0 }
 0x203   : > { %v378_v49 = vadd.f32 %v374_v48, %v730_v5 }
 0x204   : > { %v484_v50 = vpop.f32.mrf.mxu0 }
 0x205   : > { %379 = vst [vmem:[%s210_s29] sm:$0xff] %v378_v49 }
 0x206   : > { %568 = shalt.err (!%p565_p5)
}
 0x207   : > { %s569_s12 = scalar_lea.hbm %s747_s7, 128  ;;  %s573_s21 = scalar_lea.hbm %s791_s4, 256 }
 0x208   : > { %p570_p6 = scmp.ne.s32.totalorder %s747_s7, %s569_s12  ;;  %p574_p10 = scmp.lt.s32.totalorder %s747_s7, %s791_s4 }
 0x209   : > { %p575_p11 = scmp.lt.s32.totalorder %s573_s21, %s569_s12 }
 0x20a   : > { %p571_p7 = pnand %p570_p6, %p706_p4 }
 0x20b   : > { %p576_p12 = por %p575_p11, %p574_p10 }
 0x20c   : > { %p572_p9 = pneg %p571_p7 }
 0x20e   : > { %p577_p13 = pnand %p576_p12, %p572_p9 }
 0x210   : > { %580 = shalt.err (!%p577_p13)
}
 0x211   : > { %485 = dma.vmem_to_hbm [thread:$0]  (%p706_p4), %s396_s30, 128, %s747_s7, %s381_s8  }
 0x212 PF: > { %p491_p0 = scmp.ge.s32.totalorder %s631_s20, 2  ;;  %s407_s26 = sand.u32 1, %s611_s15  }
 0x213   : > { %s408_s29 = scalar_lea.sflag [#allocation4], %s407_s26 }
 0x214   : > { %p488_p1 = pnand %p491_p0, %p713_p8 }
 0x216   : > { %p489_p2 = pneg %p488_p1 }
 0x218   : > { %606 = dma.done.wait (%p489_p2), %s408_s29, 128  }
 0x219   : > { %608 = vsyncadd (%p489_p2), %s408_s29, 4294967168  ;;  %s17_s20 = sadd.s32 1, %s631_s20   ;;  %s794_s15 = smov %s615_s16 }
 0x21a   : > { %p14_p3 = scmp.ge.s32.totalorder %s17_s20, 4   ;;  %s795_s16 = smov %s619_s17 }
 0x21b   : > { %s796_s17 = smov %s719_s28  ;;  %s797_s18 = smov %s627_s19 }
 0x21c   : > { %s798_s19 = smov %s800_s23  ;;  %16 = sbr.rel (!%p14_p3) target bundleno = 4 (0x4), region = 79 }
 0x221   :  { %413 = vsyncpa [#allocation4], 1 }
 0x222   :  { %415 = vsyncpa [#allocation4 + $0x1], 1 }

</bundles_post_ra>
